<compile_context>
chip_gen: v7x
topology: tpu7x:2x2x1
jax: 0.10.0
libtpu: 0.0.40
codegen_flags: <defaults>
</compile_context>

<pallas_src>
import functools

import jax
import jax.numpy as jnp
from jax.experimental import pallas as pl
from jax.experimental.pallas import tpu as pltpu


def _row_sq_sum(a):
    """Per-row sum of squares of a (rows, D) tile, accumulated in f32 -> (rows, 1)."""
    if a.shape[1] >= 512:
        # Wide D: do the lane reduction on the (otherwise idle) MXU.
        ones = jnp.ones((a.shape[1], 1), dtype=a.dtype)
        return jnp.dot(a * a, ones, preferred_element_type=jnp.float32)
    # Narrow D: plain lane reduce, accumulating in f32.
    return jnp.sum(a * a, axis=1, keepdims=True, dtype=jnp.float32)


def _alignment_loss_kernel(x_ref, y_ref, o_ref, sxx_ref, syy_ref, sxy_ref,
                           *, n_rows, tile_rows, ragged):
    i = pl.program_id(0)

    @pl.when(i == 0)
    def _init():
        sxx_ref[...] = jnp.zeros_like(sxx_ref)
        syy_ref[...] = jnp.zeros_like(syy_ref)
        sxy_ref[...] = jnp.zeros_like(sxy_ref)

    x = x_ref[...]                      # (tile_rows, Dx), input dtype
    y = y_ref[...]                      # (tile_rows, Dy), input dtype

    rx2 = _row_sq_sum(x)                # (tile_rows, 1) f32 == ||x_i||^2
    ry2 = _row_sq_sum(y)                # (tile_rows, 1) f32 == ||y_i||^2

    if ragged:
        # Mask rows of the (padded) last tile that fall past the real batch size.
        row = jax.lax.broadcasted_iota(jnp.int32, rx2.shape, 0) + i * tile_rows
        valid = row < n_rows
        rx2 = jnp.where(valid, rx2, 0.0)
        ry2 = jnp.where(valid, ry2, 0.0)

    sxx_ref[...] += jnp.sum(rx2, axis=0, keepdims=True)                # (1,1)
    syy_ref[...] += jnp.sum(ry2, axis=0, keepdims=True)                # (1,1)
    sxy_ref[...] += jnp.sum(jnp.sqrt(rx2 * ry2), axis=0, keepdims=True)  # (1,1)

    @pl.when(i == pl.num_programs(0) - 1)
    def _finalize():
        sxx = sxx_ref[...]
        syy = syy_ref[...]
        sxy = sxy_ref[...]
        # mean((nx nx^T - ny ny^T)^2) = (Sxx^2 - 2 Sxy^2 + Syy^2) / N^2
        #                             = ((Sxx - Syy)^2 + 2 (Sxx*Syy - Sxy^2)) / N^2
        num = (sxx - syy) * (sxx - syy) + 2.0 * (sxx * syy - sxy * sxy)
        o_ref[...] = num * (1.0 / float(n_rows * n_rows))


def alignment_loss(x, y, *, block_rows=None):
    """Pallas equivalent of Alignment_loss().forward(x, y).

    x: (N, Dx) float array, y: (N, Dy) float array (same N).
    Returns scalar f32 loss (MSE with mean reduction, as nn.MSELoss()).
    """
    assert x.ndim == 2 and y.ndim == 2 and x.shape[0] == y.shape[0]
    N, Dx = x.shape
    _, Dy = y.shape

    itemsize = max(x.dtype.itemsize, y.dtype.itemsize)
    row_bytes = (Dx + Dy) * itemsize

    if block_rows is None:
        # Keep the double-buffered (2 inputs x 2 buffers) tile footprint ~<= 8 MiB.
        budget = 8 * 1024 * 1024
        tn = budget // max(4 * row_bytes, 1)
        tn = max(8, min(1024, (tn // 8) * 8))
    else:
        tn = int(block_rows)
        assert tn > 0 and (tn >= N or tn % 8 == 0), "block_rows must be a multiple of 8"
    if tn >= N:
        tn = N          # full-extent block on the row dim (exempt from the 8-row rule)

    grid = (pl.cdiv(N, tn),)
    ragged = (N % tn) != 0

    kernel = functools.partial(
        _alignment_loss_kernel, n_rows=N, tile_rows=tn, ragged=ragged)

    out = pl.pallas_call(
        kernel,
        out_shape=jax.ShapeDtypeStruct((1, 1), jnp.float32),
        grid_spec=pltpu.PrefetchScalarGridSpec(
            num_scalar_prefetch=0,
            grid=grid,
            in_specs=[
                pl.BlockSpec((tn, Dx), lambda i: (i, 0)),
                pl.BlockSpec((tn, Dy), lambda i: (i, 0)),
            ],
            out_specs=pl.BlockSpec((1, 1), lambda i: (0, 0)),
            scratch_shapes=[pltpu.VMEM((1, 1), jnp.float32)] * 3,  # Sxx, Syy, Sxy
        ),
        compiler_params=pltpu.CompilerParams(
            dimension_semantics=("arbitrary",),        # reduction/accumulation axis
            vmem_limit_bytes=32 * 1024 * 1024,         # explicit; safe on v5e/v6e/v7x
        ),
    )(x, y)
    return out[0, 0]


if __name__ == "__main__":
    key = jax.random.PRNGKey(0)
    kx, ky, kx2, ky2 = jax.random.split(key, 4)

    def ref_loss(x, y):
        nx = jnp.linalg.norm(x.astype(jnp.float32), axis=1, keepdims=True)
        ny = jnp.linalg.norm(y.astype(jnp.float32), axis=1, keepdims=True)
        return jnp.mean((nx @ nx.T - ny @ ny.T) ** 2)

    # Case 1: small shapes consistent with the module's forward (single tile).
    N, Dx, Dy = 8, 32, 48
    x = jax.random.normal(kx, (N, Dx), dtype=jnp.float32)
    y = jax.random.normal(ky, (N, Dy), dtype=jnp.float32)
    loss = jax.block_until_ready(alignment_loss(x, y))
    ref = ref_loss(x, y)
    assert jnp.allclose(loss, ref, rtol=1e-3, atol=1e-3), (loss, ref)

    # Case 2: multi-tile streaming path with a ragged last tile (exercises the
    # grid accumulation, pl.when init/finalize and row masking).
    N2, D2x, D2y = 40, 64, 96
    x2 = jax.random.normal(kx2, (N2, D2x), dtype=jnp.float32)
    y2 = jax.random.normal(ky2, (N2, D2y), dtype=jnp.float32)
    loss2 = jax.block_until_ready(alignment_loss(x2, y2, block_rows=16))
    ref2 = ref_loss(x2, y2)
    assert jnp.allclose(loss2, ref2, rtol=1e-3, atol=1e-3), (loss2, ref2)

    print("KERNEL_OK")
</pallas_src>

<mosaic_0001>
module attributes {stable_mosaic.version = 11 : i64} {
  func.func @_alignment_loss_kernel(%arg0: i32, %arg1: memref<8x32xf32, #tpu.memory_space<vmem>>, %arg2: memref<8x48xf32, #tpu.memory_space<vmem>>, %arg3: memref<1x1xf32, #tpu.memory_space<vmem>>, %arg4: memref<1x1xf32, #tpu.memory_space<vmem>>, %arg5: memref<1x1xf32, #tpu.memory_space<vmem>>, %arg6: memref<1x1xf32, #tpu.memory_space<vmem>>) attributes {dimension_semantics = [#tpu.dimension_semantics<arbitrary>], iteration_bounds = array<i64: 1>, scalar_prefetch = 0 : i64, scratch_operands = 3 : i64, tpu.core_type = #tpu.core_type<tc>, window_params = [{transform_indices = @transform_0, window_bounds = array<i64: 8, 32>}, {transform_indices = @transform_1, window_bounds = array<i64: 8, 48>}, {pipeline_mode = #tpu.pipeline_mode<synchronous>, transform_indices = @transform_2, window_bounds = array<i64: 1, 1>}]} {
    %c0_i32 = arith.constant 0 : i32
    %0 = arith.cmpi eq, %arg0, %c0_i32 : i32
    %1 = arith.extui %0 : i1 to i32
    %c0_i32_0 = arith.constant 0 : i32
    %2 = arith.cmpi ne, %1, %c0_i32_0 : i32
    scf.if %2 {
      %cst_22 = arith.constant 0.000000e+00 : f32
      %31 = vector.broadcast %cst_22 : f32 to vector<1x1xf32>
      %c0_23 = arith.constant 0 : index
      %c0_24 = arith.constant 0 : index
      %32 = vector.load %arg4[%c0_23, %c0_24] : memref<1x1xf32, #tpu.memory_space<vmem>>, vector<1x1xf32>
      tpu.vector_store %arg4[%c0_23, %c0_24], %31 {strides = array<i32>} : memref<1x1xf32, #tpu.memory_space<vmem>>, vector<1x1xf32>,
      %cst_25 = arith.constant 0.000000e+00 : f32
      %33 = vector.broadcast %cst_25 : f32 to vector<1x1xf32>
      %c0_26 = arith.constant 0 : index
      %c0_27 = arith.constant 0 : index
      %34 = vector.load %arg5[%c0_26, %c0_27] : memref<1x1xf32, #tpu.memory_space<vmem>>, vector<1x1xf32>
      tpu.vector_store %arg5[%c0_26, %c0_27], %33 {strides = array<i32>} : memref<1x1xf32, #tpu.memory_space<vmem>>, vector<1x1xf32>,
      %cst_28 = arith.constant 0.000000e+00 : f32
      %35 = vector.broadcast %cst_28 : f32 to vector<1x1xf32>
      %c0_29 = arith.constant 0 : index
      %c0_30 = arith.constant 0 : index
      %36 = vector.load %arg6[%c0_29, %c0_30] : memref<1x1xf32, #tpu.memory_space<vmem>>, vector<1x1xf32>
      tpu.vector_store %arg6[%c0_29, %c0_30], %35 {strides = array<i32>} : memref<1x1xf32, #tpu.memory_space<vmem>>, vector<1x1xf32>,
    } else {
    }
    %c0 = arith.constant 0 : index
    %c0_1 = arith.constant 0 : index
    %3 = vector.load %arg1[%c0, %c0_1] : memref<8x32xf32, #tpu.memory_space<vmem>>, vector<8x32xf32>
    %c0_2 = arith.constant 0 : index
    %c0_3 = arith.constant 0 : index
    %4 = vector.load %arg2[%c0_2, %c0_3] : memref<8x48xf32, #tpu.memory_space<vmem>>, vector<8x48xf32>
    %5 = arith.mulf %3, %3 : vector<8x32xf32>
    %cst = arith.constant dense<0.000000e+00> : vector<8xf32>
    %6 = vector.multi_reduction <add>, %5, %cst [1] : vector<8x32xf32> to vector<8xf32>
    %7 = vector.shape_cast %6 : vector<8xf32> to vector<8x1xf32>
    %8 = arith.mulf %4, %4 : vector<8x48xf32>
    %cst_4 = arith.constant dense<0.000000e+00> : vector<8xf32>
    %9 = vector.multi_reduction <add>, %8, %cst_4 [1] : vector<8x48xf32> to vector<8xf32>
    %10 = vector.shape_cast %9 : vector<8xf32> to vector<8x1xf32>
    %c0_5 = arith.constant 0 : index
    %c0_6 = arith.constant 0 : index
    %11 = vector.load %arg4[%c0_5, %c0_6] : memref<1x1xf32, #tpu.memory_space<vmem>>, vector<1x1xf32>
    %cst_7 = arith.constant dense<0.000000e+00> : vector<1xf32>
    %12 = vector.multi_reduction <add>, %7, %cst_7 [0] : vector<8x1xf32> to vector<1xf32>
    %13 = vector.shape_cast %12 : vector<1xf32> to vector<1x1xf32>
    %14 = arith.addf %11, %13 : vector<1x1xf32>
    %c0_8 = arith.constant 0 : index
    %c0_9 = arith.constant 0 : index
    %15 = vector.load %arg4[%c0_8, %c0_9] : memref<1x1xf32, #tpu.memory_space<vmem>>, vector<1x1xf32>
    tpu.vector_store %arg4[%c0_8, %c0_9], %14 {strides = array<i32>} : memref<1x1xf32, #tpu.memory_space<vmem>>, vector<1x1xf32>,
    %c0_10 = arith.constant 0 : index
    %c0_11 = arith.constant 0 : index
    %16 = vector.load %arg5[%c0_10, %c0_11] : memref<1x1xf32, #tpu.memory_space<vmem>>, vector<1x1xf32>
    %cst_12 = arith.constant dense<0.000000e+00> : vector<1xf32>
    %17 = vector.multi_reduction <add>, %10, %cst_12 [0] : vector<8x1xf32> to vector<1xf32>
    %18 = vector.shape_cast %17 : vector<1xf32> to vector<1x1xf32>
    %19 = arith.addf %16, %18 : vector<1x1xf32>
    %c0_13 = arith.constant 0 : index
    %c0_14 = arith.constant 0 : index
    %20 = vector.load %arg5[%c0_13, %c0_14] : memref<1x1xf32, #tpu.memory_space<vmem>>, vector<1x1xf32>
    tpu.vector_store %arg5[%c0_13, %c0_14], %19 {strides = array<i32>} : memref<1x1xf32, #tpu.memory_space<vmem>>, vector<1x1xf32>,
    %c0_15 = arith.constant 0 : index
    %c0_16 = arith.constant 0 : index
    %21 = vector.load %arg6[%c0_15, %c0_16] : memref<1x1xf32, #tpu.memory_space<vmem>>, vector<1x1xf32>
    %22 = arith.mulf %7, %10 : vector<8x1xf32>
    %23 = math.sqrt %22 : vector<8x1xf32>
    %cst_17 = arith.constant dense<0.000000e+00> : vector<1xf32>
    %24 = vector.multi_reduction <add>, %23, %cst_17 [0] : vector<8x1xf32> to vector<1xf32>
    %25 = vector.shape_cast %24 : vector<1xf32> to vector<1x1xf32>
    %26 = arith.addf %21, %25 : vector<1x1xf32>
    %c0_18 = arith.constant 0 : index
    %c0_19 = arith.constant 0 : index
    %27 = vector.load %arg6[%c0_18, %c0_19] : memref<1x1xf32, #tpu.memory_space<vmem>>, vector<1x1xf32>
    tpu.vector_store %arg6[%c0_18, %c0_19], %26 {strides = array<i32>} : memref<1x1xf32, #tpu.memory_space<vmem>>, vector<1x1xf32>,
    %c0_i32_20 = arith.constant 0 : i32
    %28 = arith.cmpi eq, %arg0, %c0_i32_20 : i32
    %29 = arith.extui %28 : i1 to i32
    %c0_i32_21 = arith.constant 0 : i32
    %30 = arith.cmpi ne, %29, %c0_i32_21 : i32
    scf.if %30 {
      %c0_22 = arith.constant 0 : index
      %c0_23 = arith.constant 0 : index
      %31 = vector.load %arg4[%c0_22, %c0_23] : memref<1x1xf32, #tpu.memory_space<vmem>>, vector<1x1xf32>
      %c0_24 = arith.constant 0 : index
      %c0_25 = arith.constant 0 : index
      %32 = vector.load %arg5[%c0_24, %c0_25] : memref<1x1xf32, #tpu.memory_space<vmem>>, vector<1x1xf32>
      %c0_26 = arith.constant 0 : index
      %c0_27 = arith.constant 0 : index
      %33 = vector.load %arg6[%c0_26, %c0_27] : memref<1x1xf32, #tpu.memory_space<vmem>>, vector<1x1xf32>
      %34 = arith.subf %31, %32 : vector<1x1xf32>
      %35 = arith.subf %31, %32 : vector<1x1xf32>
      %36 = arith.mulf %34, %35 : vector<1x1xf32>
      %37 = arith.mulf %31, %32 : vector<1x1xf32>
      %38 = arith.mulf %33, %33 : vector<1x1xf32>
      %39 = arith.subf %37, %38 : vector<1x1xf32>
      %cst_28 = arith.constant 2.000000e+00 : f32
      %40 = vector.broadcast %cst_28 : f32 to vector<1x1xf32>
      %41 = arith.mulf %40, %39 : vector<1x1xf32>
      %42 = arith.addf %36, %41 : vector<1x1xf32>
      %cst_29 = arith.constant 1.562500e-02 : f32
      %43 = vector.broadcast %cst_29 : f32 to vector<1x1xf32>
      %44 = arith.mulf %42, %43 : vector<1x1xf32>
      %c0_30 = arith.constant 0 : index
      %c0_31 = arith.constant 0 : index
      %45 = vector.load %arg3[%c0_30, %c0_31] : memref<1x1xf32, #tpu.memory_space<vmem>>, vector<1x1xf32>
      tpu.vector_store %arg3[%c0_30, %c0_31], %44 {strides = array<i32>} : memref<1x1xf32, #tpu.memory_space<vmem>>, vector<1x1xf32>,
    } else {
    }
    return
  }
  func.func @transform_0(%arg0: i32) -> (i32, i32) {
    %c0_i32 = arith.constant 0 : i32
    %c0_i32_0 = arith.constant 0 : i32
    return %arg0, %c0_i32 : i32, i32
  }
  func.func @transform_1(%arg0: i32) -> (i32, i32) {
    %c0_i32 = arith.constant 0 : i32
    %c0_i32_0 = arith.constant 0 : i32
    return %arg0, %c0_i32 : i32, i32
  }
  func.func @transform_2(%arg0: i32) -> (i32, i32) {
    %c0_i32 = arith.constant 0 : i32
    %c0_i32_0 = arith.constant 0 : i32
    %c0_i32_1 = arith.constant 0 : i32
    return %c0_i32, %c0_i32_0 : i32, i32
  }
}

</mosaic_0001>

<bundles_post_ra>
// kernel: tpu_custom_call.1
= control target key start
LH: loop header
LB: loop body
LE: loop exit
PB: predicated region body
PF: predicated region fallthrough
CT: control target
= control target key end

     0   :  { %7 = vsyncpa [#allocation6], 0  ;;  %s263_s0 = inlined_call_operand.hbm [shape: f32[8,32], index: 0, kind: input, shape index: {}]   ;;  %s264_s1 = inlined_call_operand.hbm [shape: f32[8,48], index: 1, kind: input, shape index: {}]   ;;  %s265_s2 = inlined_call_operand.hbm [shape: f32[1,1], index: 2, kind: output, shape index: {}]  }
   0x1   :  { %8 = vsyncpa [#allocation9], 0 }
   0x2   :  { %9 = vsyncpa [#allocation7], 0  ;;  %s201_s9 = smov [#allocation5]   ;;  %s202_s11 = smov [#allocation8]  }
   0x3   :  { %s16_s10 = sshll.u32 %s201_s9, 4  ;;  %s26_s12 = sshll.u32 %s202_s11, 4  ;;  %s17_s10 = int_to_ptr.vmem [resolvable:$true] %s16_s10  ;;  %s27_s12 = int_to_ptr.vmem [resolvable:$true] %s26_s12 }
   0x4   :  { %s129_s15 = scalar_lea.hbm %s263_s0, 128 }
   0x5   :  { %p130_p0 = scmp.ne.s32.totalorder %s263_s0, %s129_s15  ;;  %p133_p1 = scmp.lt.u32.totalorder %s129_s15, %s263_s0 }
   0x7   :  { %p135_p2 = pnand %p133_p1, %p130_p0 }
   0x9   :  { %138 = shalt.err (!%p135_p2)
}
   0xa   :  { %s139_s20 = scalar_lea.vmem %s17_s10, 128  ;;  %p144_p4 = scmp.lt.s32.totalorder %s17_s10, %s17_s10 }
   0xb   :  { %p140_p3 = scmp.ne.s32.totalorder %s17_s10, %s139_s20  ;;  %p145_p5 = scmp.lt.s32.totalorder %s139_s20, %s139_s20 }
   0xd   :  { %p146_p6 = por %p145_p5, %p144_p4 }
   0xf   :  { %p147_p7 = pnand %p146_p6, %p140_p3 }
  0x11   :  { %150 = shalt.err (!%p147_p7)
}
  0x12   :  { %19 = dma.hbm_to_vmem [thread:$0]  %s263_s0, 128, %s17_s10, [#allocation6]  }
  0x13   :  { %s151_s25 = scalar_lea.hbm %s264_s1, 128 }
  0x14   :  { %p152_p8 = scmp.ne.s32.totalorder %s264_s1, %s151_s25  ;;  %p155_p9 = scmp.lt.u32.totalorder %s151_s25, %s264_s1 }
  0x16   :  { %p157_p10 = pnand %p155_p9, %p152_p8 }
  0x18   :  { %160 = shalt.err (!%p157_p10)
}
  0x19   :  { %s161_s30 = scalar_lea.vmem %s27_s12, 128  ;;  %p166_p12 = scmp.lt.s32.totalorder %s27_s12, %s27_s12 }
  0x1a   :  { %p162_p11 = scmp.ne.s32.totalorder %s27_s12, %s161_s30  ;;  %p167_p13 = scmp.lt.s32.totalorder %s161_s30, %s161_s30 }
  0x1c   :  { %p168_p0 = por %p167_p13, %p166_p12 }
  0x1e   :  { %p169_p1 = pnand %p168_p0, %p162_p11 }
  0x20   :  { %172 = shalt.err (!%p169_p1)
}
  0x21   :  { %29 = dma.hbm_to_vmem [thread:$0]  %s264_s1, 128, %s27_s12, [#allocation9]  }
  0x22   :  { %195 = dma.done.wait [#allocation6], 128  }
  0x23   :  { %196 = vsyncadd [#allocation6], 4294967168 }
  0x24   :  { %197 = dma.done.wait [#allocation9], 128  }
  0x25   :  { %198 = vsyncadd [#allocation9], 4294967168  ;;  %vm40_vm0 = vcmask 0   ;;  %v203_v0 = vmov 0.0   ;;  %v44_v1 = vld [vmem:[#allocation5] sm:$0xff]  ;;  %vm47_vm1 = vcmask 261120  }
  0x26   :  { %41 = vst.msk [vmem:[#allocation2] sm:$0x1] %vm40_vm0, %v203_v0  ;;  %43 = vst.msk [vmem:[#allocation4] sm:$0x1] %vm40_vm0, %v203_v0  ;;  %v45_v2 = vld [vmem:[#allocation8] sm:$0xff]  ;;  %v46_v3 = vmul.f32 %v44_v1, %v44_v1  ;;  %vm52_vm2 = vcmask 392192  }
  0x27   :  { %42 = vst.msk [vmem:[#allocation3] sm:$0x1] %vm40_vm0, %v203_v0  ;;  %v51_v4 = vmul.f32 %v45_v2, %v45_v2  ;;  %s204_s1 = smov [#allocation10]  }
  0x28   :  { %v48_v5 = vsel %vm47_vm1, %v46_v3, 0.0  ;;  %s113_s4 = sshll.u32 %s204_s1, 4  ;;  %s114_s4 = int_to_ptr.vmem [resolvable:$true] %s113_s4 }
  0x29   :  { %49 = vadd.xlane.f32.xlu0 %v48_v5  ;;  %v53_v6 = vsel %vm52_vm2, %v51_v4, 0.0  ;;  %s173_s5 = scalar_lea.vmem %s114_s4, 16  ;;  %s177_s6 = scalar_lea.vmem %s114_s4, 32 }
  0x2a   :  { %p174_p2 = scmp.ne.s32.totalorder %s114_s4, %s173_s5  ;;  %p178_p3 = scmp.lt.s32.totalorder %s114_s4, %s114_s4 }
  0x2b   :  { %p179_p4 = scmp.lt.s32.totalorder %s177_s6, %s173_s5 }
  0x2d   :  { %54 = vadd.xlane.f32.xlu0 %v53_v6  ;;  %v56_v18 = vld [vmem:[#allocation2] sm:$0x1]  ;;  %v75_v36 = vld [vmem:[#allocation4] sm:$0x1]  ;;  %p180_p5 = por %p179_p4, %p178_p3 }
  0x2e   :  { %v66_v23 = vld [vmem:[#allocation3] sm:$0x1] }
  0x2f   :  { %p181_p6 = pnand %p180_p5, %p174_p2 }
  0xb6   :  { %v50_v7 = vpop.xlane.xlu0 %49 }
  0xb7   :  { %v57_v8 = vrot.slane %v50_v7, 4 }
  0xb9   :  { %v58_v9 = vadd.f32 %v57_v8, %v50_v7 }
  0xba   :  { %v55_v10 = vpop.xlane.xlu0 %54 }
  0xbb   :  { %v59_v11 = vrot.slane %v58_v9, 2  ;;  %v67_v12 = vrot.slane %v55_v10, 4  ;;  %v76_v13 = vmul.f32 %v55_v10, %v50_v7 }
  0xbd   :  { %v60_v14 = vadd.f32 %v59_v11, %v58_v9  ;;  %v68_v15 = vadd.f32 %v67_v12, %v55_v10  ;;  %127 = vrsqrt.f32 %v76_v13  ;;  %vm79_vm3 = vcmp.eq.f32.partialorder %v76_v13, inf }
  0xbe   :  { %v82_v28 = vand.u32 2147483648, %v76_v13  ;;  %vm81_vm4 = vcmp.eq.f32.partialorder %v76_v13, 0.0 }
  0xbf   :  { %v61_v16 = vrot.slane %v60_v14, 1  ;;  %v69_v17 = vrot.slane %v68_v15, 2 }
  0xc1   :  { %v62_v19 = vadd.f32 %v61_v16, %v60_v14  ;;  %v70_v20 = vadd.f32 %v69_v17, %v68_v15 }
  0xc3   :  { %v63_v21 = vadd.f32 %v62_v19, %v56_v18  ;;  %v71_v22 = vrot.slane %v70_v20, 1 }
  0xc5   :  { %65 = vst.msk [vmem:[#allocation2] sm:$0x1] %vm40_vm0, %v63_v21  ;;  %v72_v24 = vadd.f32 %v71_v22, %v70_v20 }
  0xc7   :  { %v128_v25 = vpop.eup %127  ;;  %v73_v26 = vadd.f32 %v72_v24, %v66_v23 }
  0xc8   :  { %v78_v27 = vmul.f32 %v128_v25, %v76_v13 }
  0xc9   :  { %74 = vst.msk [vmem:[#allocation3] sm:$0x1] %vm40_vm0, %v73_v26 }
  0xca   :  { %v80_v29 = vsel %vm79_vm3, %v76_v13, %v78_v27 }
  0xcb   :  { %v83_v30 = vsel %vm81_vm4, %v82_v28, %v80_v29 }
  0xcc   :  { %v84_v31 = vrot.slane %v83_v30, 4  ;;  %v95_v40 = vld [vmem:[#allocation2] sm:$0x1] }
  0xce   :  { %v85_v32 = vadd.f32 %v84_v31, %v83_v30 }
  0xd0   :  { %v86_v33 = vrot.slane %v85_v32, 2  ;;  %v96_v39 = vld [vmem:[#allocation3] sm:$0x1] }
  0xd1   :  { %v98_v42 = vsub.f32 %v95_v40, %v96_v39  ;;  %v100_v43 = vmul.f32 %v96_v39, %v95_v40 }
  0xd2   :  { %v87_v34 = vadd.f32 %v86_v33, %v85_v32 }
  0xd3   :  { %v99_v46 = vmul.f32 %v98_v42, %v98_v42 }
  0xd4   :  { %v88_v35 = vrot.slane %v87_v34, 1 }
  0xd6   :  { %v89_v37 = vadd.f32 %v88_v35, %v87_v34 }
  0xd8   :  { %v90_v38 = vadd.f32 %v89_v37, %v75_v36 }
  0xda   :  { %91 = vst.msk [vmem:[#allocation4] sm:$0x1] %vm40_vm0, %v90_v38 }
  0xe1   :  { %v97_v41 = vld [vmem:[#allocation4] sm:$0x1] }
  0xe2   :  { %v101_v44 = vmul.f32 %v97_v41, %v97_v41 }
  0xe4   :  { %v102_v45 = vsub.f32 %v100_v43, %v101_v44 }
  0xe6   :  { %v103_v47 = vmul.f32 2.0, %v102_v45 }
  0xe8   :  { %v104_v48 = vadd.f32 %v103_v47, %v99_v46 }
  0xea   :  { %v105_v49 = vmul.f32 0.015625, %v104_v48 }
  0xec   :  { %106 = vst.msk [vmem:[#allocation10] sm:$0x1] %vm40_vm0, %v105_v49 }
  0xed   :  { %184 = shalt.err (!%p181_p6)
}
  0xee   :  { %s185_s9 = scalar_lea.hbm %s265_s2, 16 }
  0xef   :  { %p186_p7 = scmp.ne.s32.totalorder %s265_s2, %s185_s9  ;;  %p189_p8 = scmp.lt.u32.totalorder %s185_s9, %s265_s2 }
  0xf1   :  { %p191_p9 = pnand %p189_p8, %p186_p7 }
  0xf3   :  { %194 = shalt.err (!%p191_p9)
}
  0xf4   :  { %116 = dma.vmem_to_hbm [thread:$0]  %s114_s4, 16, %s265_s2, [#allocation7]  }
  0xf5   :  { %199 = dma.done.wait [#allocation7], 16  }
  0xf6   :  { %200 = vsyncadd [#allocation7], 4294967280 }
  0xf7   :  { %120 = vsyncpa [#allocation6], 1 }
  0xf8   :  { %121 = vsyncpa [#allocation9], 1 }
  0xf9   :  { %122 = vsyncpa [#allocation7], 1 }

</bundles_post_ra>
